<compile_context>
chip_gen: v6e
topology: v6e:2x2x1
jax: 0.10.0
libtpu: 0.0.40
codegen_flags: <defaults>
</compile_context>

<pallas_src>
import jax
import jax.numpy as jnp
from jax.experimental import pallas as pl
from jax.experimental.pallas import tpu as pltpu


def _class_pos_encode_kernel(idx_ref, x_ref, pe_ref, o_ref):
    """Vectorized gather-add for one tile of flattened (B*S) rows.

    idx_ref : VMEM (row_tile, 1) int32   -- flat unmask indices for this tile
    x_ref   : VMEM (row_tile, E)         -- patch-embedding rows for this tile
    pe_ref  : VMEM (P1, E)               -- full position-encoding table (resident)
    o_ref   : VMEM (row_tile, E)         -- output tile
    """
    row_tile = x_ref.shape[0]
    n_table = pe_ref.shape[0]

    # One-hot row selector: (row_tile, 1) vs iota (row_tile, n_table).
    idx = idx_ref[...] + 1                                             # +1: row 0 is cls token
    cols = jax.lax.broadcasted_iota(jnp.int32, (row_tile, n_table), 1)
    onehot = (idx == cols).astype(jnp.float32)                         # (row_tile, n_table)

    # MXU gather: exact for a 0/1 one-hot with f32 operands + f32 accumulation.
    gathered = jnp.dot(onehot, pe_ref[...].astype(jnp.float32),
                       preferred_element_type=jnp.float32)             # (row_tile, E)

    o_ref[...] = (x_ref[...].astype(jnp.float32) + gathered).astype(o_ref.dtype)


def _choose_row_tile(rows, emb, in_bytes, out_bytes, target=512):
    """Pick (row_tile, needs_padding).

    Goals: (a) double-buffered in+out tiles stay under ~12 MiB so every TPU
    generation's default scoped VMEM is safe; (b) row_tile divides `rows`
    whenever possible so no wrapper-side pad/slice HBM copies are needed;
    (c) >= 2 grid steps when cleanly splittable so v7x's dual TensorCores both
    get work via the "parallel" grid axis.
    """
    budget = 12 << 20
    per_row = 2 * emb * (in_bytes + out_bytes) + 2 * 4   # dbl-buffered x/out + idx
    cap = max(8, min(target, budget // per_row))

    if rows <= cap:
        if rows % 16 == 0 and rows >= 16:
            return rows // 2, False        # two parallel tiles (dual-TC on v7x)
        return rows, False                 # single full-extent tile

    # Largest multiple-of-8 divisor of rows that fits the cap -> no padding.
    best = None
    for t in range((cap // 8) * 8, 7, -8):
        if rows % t == 0:
            best = t
            break
    # Accept it unless pathologically small (>8x below the cap), where padding
    # one tail tile is cheaper than hundreds of tiny grid steps.
    if best is not None and best * 8 >= cap:
        return best, False
    return (cap // 8) * 8, True


def class_position_encode(unmask_patch_embed, unmask_idx, pe_encode, *, row_tile_target=512):
    """pe = unmask_patch_embed + pe_encode.squeeze(0)[unmask_idx + 1, :]"""
    B, S, E = unmask_patch_embed.shape
    pe_table = pe_encode.reshape(pe_encode.shape[-2], E)   # squeeze(0): (n_patch + 1, E)
    P1 = pe_table.shape[0]

    # Pad the tiny parameter table to a sublane multiple once (negligible bytes;
    # padded rows are never selected by valid indices).  This keeps the MXU
    # contraction dim 8-aligned.
    p1_pad = ((P1 + 7) // 8) * 8
    if p1_pad != P1:
        pe_table = jnp.pad(pe_table, ((0, p1_pad - P1), (0, 0)))

    out_dtype = jnp.promote_types(unmask_patch_embed.dtype, pe_table.dtype)

    rows = B * S
    x2d = unmask_patch_embed.reshape(rows, E)
    idx2d = unmask_idx.reshape(rows, 1).astype(jnp.int32)

    in_b = jnp.dtype(unmask_patch_embed.dtype).itemsize
    out_b = jnp.dtype(out_dtype).itemsize
    pe_b = jnp.dtype(pe_table.dtype).itemsize

    row_tile, _ = _choose_row_tile(rows, E, in_b, out_b, target=row_tile_target)
    rows_padded = pl.cdiv(rows, row_tile) * row_tile
    if rows_padded != rows:
        # Rare fallback only (rows not divisible by 8 / no usable divisor); the
        # common path avoids these extra HBM copies entirely.
        x2d = jnp.pad(x2d, ((0, rows_padded - rows), (0, 0)))
        idx2d = jnp.pad(idx2d, ((0, rows_padded - rows), (0, 0)))

    cost = pl.CostEstimate(
        flops=2 * rows_padded * p1_pad * E + rows_padded * E,
        transcendentals=0,
        bytes_accessed=rows_padded * E * (in_b + out_b) + p1_pad * E * pe_b + rows_padded * 4,
    )

    out2d = pl.pallas_call(
        _class_pos_encode_kernel,
        out_shape=jax.ShapeDtypeStruct((rows_padded, E), out_dtype),
        grid=(rows_padded // row_tile,),
        in_specs=[
            # flat indices: regular VMEM input (vectorized compare needs vregs)
            pl.BlockSpec((row_tile, 1), lambda t: (t, 0)),
            # patch-embedding rows: one (row_tile, E) tile per grid step
            pl.BlockSpec((row_tile, E), lambda t: (t, 0)),
            # full position table, constant block index -> DMA'd once, resident
            pl.BlockSpec((p1_pad, E), lambda t: (0, 0)),
        ],
        out_specs=pl.BlockSpec((row_tile, E), lambda t: (t, 0)),
        compiler_params=pltpu.CompilerParams(
            dimension_semantics=("parallel",),   # independent rows -> dual-TC on v7x
        ),
        cost_estimate=cost,
    )(idx2d, x2d, pe_table)

    if rows_padded != rows:
        out2d = out2d[:rows]
    return out2d.reshape(B, S, E)


if __name__ == "__main__":
    # Small shapes consistent with the module.
    B = 2          # batch
    n_patch = 16   # number of patches
    S = 8          # number of *unmasked* patches kept
    E = 32         # emb_dim

    key = jax.random.PRNGKey(0)
    k_cls, k_pe, k_x, k_idx = jax.random.split(key, 4)

    # Deterministic "parameters" (shapes from __init__).
    cls_encode = jax.random.normal(k_cls, (1, 1, E), dtype=jnp.float32)  # param, unused in forward
    pe_encode = jax.random.normal(k_pe, (1, n_patch + 1, E), dtype=jnp.float32)

    # Inputs.
    unmask_patch_embed = jax.random.normal(k_x, (B, S, E), dtype=jnp.float32)
    unmask_idx = jax.random.randint(k_idx, (B, S), 0, n_patch, dtype=jnp.int32)

    out = class_position_encode(unmask_patch_embed, unmask_idx, pe_encode)
    out = jax.block_until_ready(out)

    # Pure-JAX reference check of the forward semantics.
    ref = unmask_patch_embed + pe_encode[0][unmask_idx + 1, :]
    assert out.shape == ref.shape and out.dtype == ref.dtype
    assert jnp.allclose(out, ref, atol=1e-5, rtol=1e-5), "mismatch vs reference"

    print("KERNEL_OK")
</pallas_src>

<mosaic_0001>
module attributes {stable_mosaic.version = 11 : i64} {
  func.func @_class_pos_encode_kernel(%arg0: i32, %arg1: memref<8x1xi32, #tpu.memory_space<vmem>>, %arg2: memref<8x32xf32, #tpu.memory_space<vmem>>, %arg3: memref<24x32xf32, #tpu.memory_space<vmem>>, %arg4: memref<8x32xf32, #tpu.memory_space<vmem>>) attributes {dimension_semantics = [#tpu.dimension_semantics<parallel>], iteration_bounds = array<i64: 2>, scalar_prefetch = 0 : i64, scratch_operands = 0 : i64, tpu.core_type = #tpu.core_type<tc>, window_params = [{transform_indices = @transform_0, window_bounds = array<i64: 8, 1>}, {transform_indices = @transform_1, window_bounds = array<i64: 8, 32>}, {pipeline_mode = #tpu.pipeline_mode<synchronous>, transform_indices = @transform_2, window_bounds = array<i64: 24, 32>}, {transform_indices = @transform_3, window_bounds = array<i64: 8, 32>}]} {
    %c0 = arith.constant 0 : index
    %c0_0 = arith.constant 0 : index
    %0 = vector.load %arg1[%c0, %c0_0] : memref<8x1xi32, #tpu.memory_space<vmem>>, vector<8x1xi32>
    %c1_i32 = arith.constant 1 : i32
    %1 = vector.broadcast %c1_i32 : i32 to vector<8x1xi32>
    %2 = arith.addi %0, %1 : vector<8x1xi32>
    %3 = tpu.iota {dimensions = array<i32: 1>} : vector<8x24xi32>
    %4 = vector.broadcast %2 : vector<8x1xi32> to vector<8x24xi32>
    %5 = arith.cmpi eq, %4, %3 : vector<8x24xi32>
    %6 = arith.extui %5 : vector<8x24xi1> to vector<8x24xi32>
    %7 = arith.sitofp %6 : vector<8x24xi32> to vector<8x24xf32>
    %c0_1 = arith.constant 0 : index
    %c0_2 = arith.constant 0 : index
    %8 = vector.load %arg3[%c0_1, %c0_2] : memref<24x32xf32, #tpu.memory_space<vmem>>, vector<24x32xf32>
    %cst = arith.constant dense<0.000000e+00> : vector<8x32xf32>
    %9 = tpu.matmul %7, %8, %cst {dimension_numbers = #tpu.dot_dimension_numbers<[1], [0], [0], [1], [0, 0, 1, 1], [], []>} : vector<8x24xf32>, vector<24x32xf32>, vector<8x32xf32> -> vector<8x32xf32>
    %c0_3 = arith.constant 0 : index
    %c0_4 = arith.constant 0 : index
    %10 = vector.load %arg2[%c0_3, %c0_4] : memref<8x32xf32, #tpu.memory_space<vmem>>, vector<8x32xf32>
    %11 = arith.addf %10, %9 : vector<8x32xf32>
    %c0_5 = arith.constant 0 : index
    %c0_6 = arith.constant 0 : index
    %12 = vector.load %arg4[%c0_5, %c0_6] : memref<8x32xf32, #tpu.memory_space<vmem>>, vector<8x32xf32>
    tpu.vector_store %arg4[%c0_5, %c0_6], %11 {strides = array<i32>} : memref<8x32xf32, #tpu.memory_space<vmem>>, vector<8x32xf32>,
    return
  }
  func.func @transform_0(%arg0: i32) -> (i32, i32) {
    %c0_i32 = arith.constant 0 : i32
    %c0_i32_0 = arith.constant 0 : i32
    return %arg0, %c0_i32 : i32, i32
  }
  func.func @transform_1(%arg0: i32) -> (i32, i32) {
    %c0_i32 = arith.constant 0 : i32
    %c0_i32_0 = arith.constant 0 : i32
    return %arg0, %c0_i32 : i32, i32
  }
  func.func @transform_2(%arg0: i32) -> (i32, i32) {
    %c0_i32 = arith.constant 0 : i32
    %c0_i32_0 = arith.constant 0 : i32
    %c0_i32_1 = arith.constant 0 : i32
    return %c0_i32, %c0_i32_0 : i32, i32
  }
  func.func @transform_3(%arg0: i32) -> (i32, i32) {
    %c0_i32 = arith.constant 0 : i32
    %c0_i32_0 = arith.constant 0 : i32
    return %arg0, %c0_i32 : i32, i32
  }
}

</mosaic_0001>

<bundles_post_ra>
// kernel: tpu_custom_call.1
= control target key start
LH: loop header
LB: loop body
LE: loop exit
PB: predicated region body
PF: predicated region fallthrough
CT: control target
= control target key end

     0   :  { %8 = vsyncpa [#allocation3], 0  ;;  %s703_s0 = inlined_call_operand.vmem [shape: s32[16,1], index: 0, kind: input, shape index: {}]   ;;  %s704_s1 = inlined_call_operand.vmem [shape: f32[16,32], index: 1, kind: input, shape index: {}]   ;;  %s705_s2 = inlined_call_operand.hbm [shape: f32[24,32], index: 2, kind: input, shape index: {}]   ;;  %s706_s3 = inlined_call_operand.hbm [shape: f32[16,32], index: 3, kind: output, shape index: {}]  }
   0x1   :  { %9 = vsyncpa [#allocation4], 0 }
   0x2   :  { %11 = vsyncpa [#allocation4 + $0x1], 0  ;;  %s589_s12 = smov 0   ;;  %s591_s13 = smov 0  }
   0x3   :  { %s593_s14 = smov 0   ;;  %s595_s15 = smov 0  }
   0x4 LB: > { %s610_s16 = sadd.s32 4294967295, %s560_s15   ;;  %s386_s17 = sadd.s32 4294967294, %s560_s15   ;;  %s560_s15 = sphi %s595_s15, %s714_s15   ;;  %s556_s14 = sphi %s593_s14, %s713_s14   ;;  %s552_s13 = sphi %s591_s13, %s712_s13   ;;  %s548_s12 = sphi %s589_s12, %s711_s12  }
   0x5   : > { %s614_s18 = sadd.s32 1, %s560_s15   ;;  %s97_s19 = sadd.s32 1, %s556_s14 }
   0x6   : > { %s94_s20 = ssub.s32 %s560_s15, %s614_s18  ;;  %p107_p0 = scmp.ne.s32.totalorder %s556_s14, %s552_s13 }
   0x7   : > { %p95_p1 = scmp.eq.s32.totalorder %s94_s20, 0  ;;  %p108_p2 = scmp.eq.s32.totalorder %s610_s16, 1 }
   0x8   : > { %p113_p3 = scmp.ne.s32.totalorder %s552_s13, %s548_s12  ;;  %p114_p4 = scmp.eq.s32.totalorder %s386_s17, 1 }
   0x9   : > { %s625_s21 = scalar_select %p95_p1, %s556_s14, %s97_s19  }
   0xa   : > { %p627_p5 = por %p108_p2, %p107_p0  ;;  %p631_p6 = por %p114_p4, %p113_p3 }
   0xb   : > { %p387_p7 = scmp.ge.s32.totalorder %s560_s15, 1  ;;  %p121_p8 = scmp.lt.s32.totalorder %s560_s15, 3 }
   0xc   : > { %s708_s23 = scalar_select %p631_p6, 1, 0 }
   0xd   : > { %p428_p9 = scmp.eq.s32.totalorder %s610_s16, 0  ;;  %p638_p10 = pnand %p387_p7, %p121_p8 }
   0xe   : > { %s562_s25 = smov [#allocation2]  }
   0xf   : > { %s133_s26 = sshll.u32 %s562_s25, 4  ;;  %p420_p11 = pneg %p638_p10  ;;  %s134_s26 = int_to_ptr.vmem [resolvable:$true] %s133_s26 }
  0x10   : > { %s481_s27 = scalar_lea.vmem %s134_s26, 384  ;;  %p489_p3 = scmp.lt.s32.totalorder %s134_s26, %s134_s26 }
  0x11   : > { %p421_p12 = pnand %p428_p9, %p420_p11  ;;  %p482_p0 = scmp.ne.s32.totalorder %s134_s26, %s481_s27 }
  0x12   : > { %p490_p4 = scmp.lt.s32.totalorder %s481_s27, %s481_s27 }
  0x13   : > { %p472_p13 = pneg %p421_p12 }
  0x14   : > { %p491_p6 = por %p490_p4, %p489_p3 }
  0x15   : > { %p484_p1 = pnand %p482_p0, %p472_p13 }
  0x17   : > { %p485_p2 = pneg %p484_p1 }
  0x19   : > { %p492_p7 = pnand %p491_p6, %p485_p2 }
  0x1b   : > { %495 = shalt.err (!%p492_p7)
}
  0x1c   : > { %s563_s28 = smov 128   ;;  %s564_s29 = smov 8  }
  0x1d   : > { %423 = dma.hbm_to_vmem [thread:$0]  (!%p421_p12), %s705_s2, 384, %s134_s26, [#allocation3], %s563_s28, %s563_s28, %s564_s29  }
  0x1e   : > { %163 = sbr.rel (%p638_p10) target bundleno = 379 (0x17b), region = 32 }
  0x23   : > { %539 = dma.done.wait (%p428_p9), [#allocation3], 384  }
  0x24   : > { %541 = vsyncadd (%p428_p9), [#allocation3], 4294966912  ;;  %p190_p8 = scmp.lt.s32.totalorder %s610_s16, 1  ;;  %v565_v0 = vmov 0   ;;  %v566_v1 = vmov 0.0   ;;  %v210_v3 = vld [vmem:[#allocation2 + $0x10] sm:$0xff]  ;;  %v200_v7 = vlaneseq }
  0x25   : > { %469 = vset.pattern.permute.xlu0 %v565_v0  ;;  %405 = vmatprep.subr.mxu0 %v566_v1  ;;  %v209_v4 = vld [vmem:[#allocation2 + $0x8] sm:$0xff]  ;;  %vm567_vm0 = vmmov 0   ;;  %v208_v6 = vld [vmem:[#allocation2] sm:$0xff]  ;;  %vm211_vm1 = vcmask 195584   ;;  %s187_s10 = sand.u32 1, %s552_s13   ;;  %s398_s24 = sshll.u32 %s610_s16, 7 }
  0x26   : > { %s191_s5 = scalar_select %p190_p8, %s610_s16, 1  ;;  %411 = vmatprep.mubr.msk.f32.mxu0 %vm567_vm0, %v566_v1  ;;  %406 = vmatpush3.msra.mxu0 %v210_v3  ;;  %v201_v8 = vand.u32 127, %v200_v7  ;;  %vm287_vm3 = vcmask 261120  }
  0x27   : > { %407 = vmatprep.subr.mxu0 %v566_v1  ;;  %s392_s11 = sshll.u32 %s187_s10, 3  ;;  %s668_s29 = scalar_lea.hbm %s706_s3, %s398_s24 }
  0x28   : > { %s393_s6 = sshll.u32 %s191_s5, 3  ;;  %408 = vmatpush3.msra.mxu0 %v209_v4  ;;  %s189_s25 = scalar_lea.vmem [#allocation5], %s392_s11 }
  0x29   : > { %s193_s9 = scalar_lea.vmem %s703_s0, %s393_s6  ;;  %409 = vmatprep.subr.mxu0 %v566_v1  ;;  %s197_s20 = scalar_lea.vmem %s704_s1, %s393_s6 }
  0x2a   : > { %v198_v2 = vld [vmem:[%s193_s9] sm:$0xff]  ;;  %410 = vmatpush3.msra.mxu0 %v208_v6  ;;  %s303_s26 = sshll.u32 %s189_s25, 4  ;;  %s290_s30 = scalar_lea.sflag [#allocation4], %s187_s10  ;;  %s304_s26 = int_to_ptr.vmem [resolvable:$true] %s303_s26 }
  0x2b   : > { %v199_v5 = vadd.s32 1, %v198_v2  ;;  %v285_v11 = vld [vmem:[%s197_s20] sm:$0xff]  ;;  %s496_s4 = scalar_lea.vmem %s304_s26, 128  ;;  %s568_s16 = smov [#allocation5]  }
  0x2c   : > { %p497_p6 = scmp.ne.s32.totalorder %s304_s26, %s496_s4  ;;  %s500_s5 = sshll.u32 %s568_s16, 4  ;;  %s501_s5 = int_to_ptr.vmem [resolvable:$false] %s500_s5 }
  0x2d   : > { %203 = vperm.xlu0 %469, %v199_v5   ;;  %s502_s6 = scalar_lea.vmem %s501_s5, 256  ;;  %p503_p11 = scmp.lt.s32.totalorder %s304_s26, %s501_s5 }
  0x2e   : > { %p498_p9 = pnand %p497_p6, %p627_p5  ;;  %p504_p12 = scmp.lt.s32.totalorder %s502_s6, %s496_s4 }
  0x30   : > { %p499_p10 = pneg %p498_p9  ;;  %p505_p13 = por %p504_p12, %p503_p11 }
  0x32   : > { %p506_p0 = pnand %p505_p13, %p499_p10 }
  0xa8   : > { %v204_v9 = vpop.permute.xlu0 %203 }
  0xa9   : > { %vm205_vm2 = vcmp.eq.s32.totalorder %v204_v9, %v201_v8 }
  0xaa   : > { %v395_v10 = vsel %vm205_vm2, 1.0, %v566_v1 }
  0xab   : > { %412 = vmatmul.mubr.msk.f32.vlgmr.msra.gmra.mxu0 %vm211_vm1, %v395_v10 }
 0x16b   : > { %v281_v12 = vpop.f32.mrf.mxu0 }
 0x16c   : > { %v286_v13 = vadd.f32 %v285_v11, %v281_v12 }
 0x16d   : > { %v413_v14 = vpop.f32.mrf.mxu0 }
 0x16e   : > { %288 = vst.msk [vmem:[%s189_s25] sm:$0xff] %vm287_vm3, %v286_v13 }
 0x16f   : > { %509 = shalt.err (!%p506_p0)
}
 0x170   : > { %s510_s7 = scalar_lea.hbm %s668_s29, 128  ;;  %s514_s10 = scalar_lea.hbm %s706_s3, 256 }
 0x171   : > { %p511_p1 = scmp.ne.s32.totalorder %s668_s29, %s510_s7  ;;  %p515_p4 = scmp.lt.s32.totalorder %s668_s29, %s706_s3 }
 0x172   : > { %p516_p7 = scmp.lt.s32.totalorder %s514_s10, %s510_s7 }
 0x173   : > { %p512_p2 = pnand %p511_p1, %p627_p5 }
 0x174   : > { %p517_p8 = por %p516_p7, %p515_p4 }
 0x175   : > { %p513_p3 = pneg %p512_p2 }
 0x177   : > { %p518_p6 = pnand %p517_p8, %p513_p3 }
 0x179   : > { %521 = shalt.err (!%p518_p6)
}
 0x17a   : > { %418 = dma.vmem_to_hbm [thread:$0]  (%p627_p5), %s304_s26, 128, %s668_s29, %s290_s30  }
 0x17b PF: > { %p430_p9 = scmp.ge.s32.totalorder %s560_s15, 2  ;;  %s315_s19 = sand.u32 1, %s548_s12  }
 0x17c   : > { %p710_p10 = scmp.ne.s32.totalorder %s708_s23, 0  ;;  %s316_s20 = scalar_lea.sflag [#allocation4], %s315_s19 }
 0x17e   : > { %p425_p11 = pnand %p430_p9, %p710_p10 }
 0x180   : > { %p426_p12 = pneg %p425_p11 }
 0x182   : > { %543 = dma.done.wait (%p426_p12), %s316_s20, 128  }
 0x183   : > { %545 = vsyncadd (%p426_p12), %s316_s20, 4294967168  ;;  %p14_p13 = scmp.ge.s32.totalorder %s614_s18, 4   ;;  %s711_s12 = smov %s552_s13 }
 0x184   : > { %s712_s13 = smov %s556_s14  ;;  %s713_s14 = smov %s625_s21 }
 0x185   : > { %s714_s15 = smov %s614_s18  ;;  %16 = sbr.rel (!%p14_p13) target bundleno = 4 (0x4), region = 75 }
 0x18a   :  { %321 = vsyncpa [#allocation3], 1 }
 0x18b   :  { %323 = vsyncpa [#allocation3 + $0x1], 1 }
 0x18c   :  { %324 = vsyncpa [#allocation4], 1 }
 0x18d   :  { %326 = vsyncpa [#allocation4 + $0x1], 1 }

</bundles_post_ra>
